<compile_context>
chip_gen: v7x
topology: tpu7x:2x2x1
jax: 0.10.0
libtpu: 0.0.40
codegen_flags: <defaults>
</compile_context>

<pallas_src>
import functools

import jax
import jax.numpy as jnp
from jax.experimental import pallas as pl
from jax.experimental.pallas import tpu as pltpu


def _round_up(n, m):
    return (n + m - 1) // m * m


def _cdiv(a, b):
    return (a + b - 1) // b


# ----------------------------------------------------------------------------
# Pallas kernel: fused 3-head MLP over a tile of rows.
# ----------------------------------------------------------------------------
def _fused_head_kernel(mask_ref, x_ref, w1t_ref, b1t_ref, w2t_ref, b2t_ref,
                       out_ref):
    # mask_ref: (1, tile) f32        x_ref: (tile, D) f32 (cast in-kernel)
    # w1t_ref : (Hp, D)   bf16       b1t_ref: (Hp, 1) f32
    # w2t_ref : (3, Hp)   bf16       b2t_ref: (3, 1)  f32
    # out_ref : (3, tile) f32   rows = [sigmoid(center)*mask, window, offset]
    w1t = w1t_ref[...]
    x = x_ref[...].astype(w1t.dtype)            # f32 -> bf16 on VPU, under DMA

    # h_t[Hp, tile] = W1t @ x^T  -> contract last dims (transposed-RHS matmul).
    h_t = jax.lax.dot_general(
        w1t, x,
        dimension_numbers=(((1,), (1,)), ((), ())),
        preferred_element_type=jnp.float32)
    h_t = jnp.maximum(h_t + b1t_ref[...], 0.0)          # bias + ReLU in f32
    h_t = h_t.astype(w2t_ref.dtype)                     # back to bf16 for MXU

    # res_t[3, tile] = W2t @ h_t  -> standard matmul.
    res_t = jax.lax.dot_general(
        w2t_ref[...], h_t,
        dimension_numbers=(((1,), (0,)), ((), ())),
        preferred_element_type=jnp.float32)
    res_t = res_t + b2t_ref[...]                        # (3, tile) f32

    # Row 0 is the center head -> sigmoid * mask; rows 1/2 are raw preds.
    rows = jax.lax.broadcasted_iota(jnp.int32, res_t.shape, 0)
    center = jax.nn.sigmoid(res_t) * mask_ref[...]      # mask (1,tile) bcasts
    out_ref[...] = jnp.where(rows == 0, center, res_t)  # single lane-dense store


# ----------------------------------------------------------------------------
# One-time parameter fusion/packing (call at model init, NOT per forward).
# ----------------------------------------------------------------------------
def pack_params(params, compute_dtype=jnp.bfloat16):
    """Fuse the 3 heads: (D,3H)+(1,3H) first layer, block-diag (3H,3) second
    layer; pad hidden to 128 lanes; pre-transpose for lane-dense compute."""
    (wc1, bc1, wc2, bc2, ww1, bw1, ww2, bw2, wo1, bo1, wo2, bo2) = params
    D, H = wc1.shape
    Hcat = 3 * H
    Hp = _round_up(max(Hcat, 128), 128)

    w1cat = jnp.concatenate([wc1, ww1, wo1], axis=1)          # (D, 3H)
    b1cat = jnp.concatenate([bc1, bw1, bo1], axis=1)          # (1, 3H)
    z = jnp.zeros((H, 1), wc2.dtype)
    w2blk = jnp.concatenate([                                  # (3H, 3) block-diag
        jnp.concatenate([wc2, z, z], axis=1),
        jnp.concatenate([z, ww2, z], axis=1),
        jnp.concatenate([z, z, wo2], axis=1)], axis=0)
    b2cat = jnp.concatenate([bc2, bw2, bo2], axis=1)          # (1, 3)

    w1t = jnp.zeros((Hp, D), jnp.float32).at[:Hcat].set(w1cat.T)
    w1t = w1t.astype(compute_dtype)                           # (Hp, D)
    b1t = jnp.zeros((Hp, 1), jnp.float32).at[:Hcat, 0].set(b1cat[0])
    w2t = jnp.zeros((3, Hp), jnp.float32).at[:, :Hcat].set(w2blk.T)
    w2t = w2t.astype(compute_dtype)                           # (3, Hp)
    b2t = b2cat.T.astype(jnp.float32)                         # (3, 1)
    return w1t, b1t, w2t, b2t


# ----------------------------------------------------------------------------
# Wrapper: pallas_call over a flattened row grid (no pad/cast copies of x).
# ----------------------------------------------------------------------------
def run_heads(x, mask, packed_params, *, tile_rows=1024):
    """x: [B, T, D] f32, mask: [B, T] -> (center, window, offset) each [B, T]."""
    w1t, b1t, w2t, b2t = packed_params
    B, T, D = x.shape
    N = B * T
    Hp = w1t.shape[0]

    # Row tile: always a multiple of 128 (lane-dense stores) regardless of the
    # caller-supplied tile_rows; capped by N.
    tile = _round_up(max(min(tile_rows, N), 1), 128)
    # If the whole problem would fit in one grid step but is big enough to be
    # worth splitting, use >=2 steps so the "parallel" axis can shard across
    # v7x's two TensorCores (harmless elsewhere).
    if _cdiv(N, tile) == 1 and N > 256:
        tile = _round_up(_cdiv(N, 2), 128)
    grid = (_cdiv(N, tile),)

    # Flat f32 views: reshape only (free), no dtype cast, no jnp.pad — partial
    # last block is handled by bounded DMAs and its garbage columns are never
    # read back (output is exactly (3, N)).
    x2 = x.reshape(N, D)
    m2 = mask.reshape(1, N).astype(jnp.float32)

    w_item = jnp.dtype(w1t.dtype).itemsize
    cost = pl.CostEstimate(
        flops=2 * N * (D * Hp + Hp * 3),
        transcendentals=3 * N,
        bytes_accessed=(N * D * x2.dtype.itemsize      # x (streamed once)
                        + N * 4                        # mask
                        + 3 * N * 4                    # output
                        + (Hp * D + 3 * Hp) * w_item
                        + (Hp + 3) * 4))

    out = pl.pallas_call(
        _fused_head_kernel,
        grid=grid,
        in_specs=[
            pl.BlockSpec((1, tile), lambda r: (0, r)),     # mask rows
            pl.BlockSpec((tile, D), lambda r: (r, 0)),     # x rows (f32)
            # Grid-invariant fused weights/biases (constant index_map): fetched
            # once and kept resident across the row grid.
            pl.BlockSpec((Hp, D), lambda r: (0, 0)),       # fused W1^T (bf16)
            pl.BlockSpec((Hp, 1), lambda r: (0, 0)),       # fused b1^T
            pl.BlockSpec((3, Hp), lambda r: (0, 0)),       # fused W2^T (bf16)
            pl.BlockSpec((3, 1), lambda r: (0, 0)),        # fused b2^T
        ],
        out_specs=pl.BlockSpec((3, tile), lambda r: (0, r)),
        out_shape=jax.ShapeDtypeStruct((3, N), jnp.float32),
        compiler_params=pltpu.CompilerParams(
            dimension_semantics=("parallel",)),
        cost_estimate=cost,
    )(m2, x2, w1t, b1t, w2t, b2t)

    preds = out.reshape(3, B, T)
    return preds[0], preds[1], preds[2]


# ----------------------------------------------------------------------------
# Boundary assembly glue (cheap, plain JAX) — mirrors get_boundary.
# ----------------------------------------------------------------------------
def get_boundary(center_pred, window_pred, offset_pred,
                 kernel=1, unit=2, max_num_moments=100):
    B, T = center_pred.shape
    # max_pool1d NMS: with kernel=1 (module default) hmax == center_pred, so
    # `keep` is all-ones and the NMS step is the identity.
    assert kernel == 1, "only the module default kernel=1 is supported here"
    topk = min(max_num_moments, T)
    scores, inds = jax.lax.top_k(center_pred, topk)                 # [B, topk]
    off = jnp.take_along_axis(offset_pred, inds, axis=1)
    center = jnp.clip(inds.astype(jnp.float32) + off, 0.0, T - 1.0)
    window = jnp.clip(jnp.take_along_axis(window_pred, inds, axis=1), 0.0, None)
    start = jnp.clip(center - window / 2.0, 0.0, T - 1.0) * unit
    end = jnp.clip(center + window / 2.0, 0.0, T - 1.0) * unit + unit
    return jnp.stack([start, end, scores], axis=-1)                 # [B, topk, 3]


def boundary_head_forward(x, saliency, packed_params, *, kernel=1, unit=2,
                          max_num_moments=100, tile_rows=1024):
    mask = jnp.where(saliency >= 0, 1.0, 0.0).astype(jnp.float32)
    center_pred, window_pred, offset_pred = run_heads(
        x, mask, packed_params, tile_rows=tile_rows)
    boundary = get_boundary(center_pred, window_pred, offset_pred,
                            kernel=kernel, unit=unit,
                            max_num_moments=max_num_moments)
    return center_pred, window_pred, offset_pred, boundary


# ----------------------------------------------------------------------------
# Pure-JAX f32 reference of the same forward math (for correctness check).
# ----------------------------------------------------------------------------
def _reference_heads(x, mask, params):
    (wc1, bc1, wc2, bc2, ww1, bw1, ww2, bw2, wo1, bo1, wo2, bo2) = params

    def mlp(w1, b1, w2, b2):
        h = jnp.maximum(jnp.einsum('btd,dh->bth', x, w1) + b1[0], 0.0)
        return (jnp.einsum('bth,ho->bto', h, w2) + b2[0])[..., 0]

    c = jax.nn.sigmoid(mlp(wc1, bc1, wc2, bc2)) * mask
    w = mlp(ww1, bw1, ww2, bw2)
    o = mlp(wo1, bo1, wo2, bo2)
    return c, w, o


if __name__ == "__main__":
    B, T, D, H = 2, 8, 32, 16      # dims = (D, H, 1) for build_linear_modules

    key = jax.random.PRNGKey(0)
    k_x, k_sal, k_p = jax.random.split(key, 3)

    x = jax.random.normal(k_x, (B, T, D), jnp.float32)
    saliency = jax.random.randint(k_sal, (B, T), -1, 3).astype(jnp.float32)

    def init_head(k):
        k1, k2, k3, k4 = jax.random.split(k, 4)
        return (jax.random.normal(k1, (D, H), jnp.float32) * 0.1,
                jax.random.normal(k2, (1, H), jnp.float32) * 0.1,
                jax.random.normal(k3, (H, 1), jnp.float32) * 0.1,
                jax.random.normal(k4, (1, 1), jnp.float32) * 0.1)

    kc, kw, ko = jax.random.split(k_p, 3)
    params = init_head(kc) + init_head(kw) + init_head(ko)

    # One-time weight fusion/packing (model-init time, not per forward call).
    packed = jax.tree_util.tree_map(jax.block_until_ready,
                                    pack_params(params, jnp.bfloat16))

    fwd = jax.jit(functools.partial(boundary_head_forward,
                                    kernel=1, unit=2, max_num_moments=100))
    center_pred, window_pred, offset_pred, boundary = fwd(x, saliency, packed)
    jax.block_until_ready(boundary)

    # Correctness check vs pure-f32 reference. The kernel uses bf16 MXU inputs
    # with f32 accumulation, so tolerance is relaxed accordingly.
    mask = jnp.where(saliency >= 0, 1.0, 0.0).astype(jnp.float32)
    c_ref, w_ref, o_ref = _reference_heads(x, mask, params)
    assert jnp.allclose(center_pred, c_ref, atol=5e-2, rtol=5e-2), "center mismatch"
    assert jnp.allclose(window_pred, w_ref, atol=5e-2, rtol=5e-2), "window mismatch"
    assert jnp.allclose(offset_pred, o_ref, atol=5e-2, rtol=5e-2), "offset mismatch"
    assert boundary.shape == (B, min(100, T), 3)

    print("KERNEL_OK")
</pallas_src>

<mosaic_0001>
module attributes {stable_mosaic.version = 11 : i64} {
  func.func @_fused_head_kernel(%arg0: i32, %arg1: memref<1x128xf32, #tpu.memory_space<vmem>>, %arg2: memref<128x32xf32, #tpu.memory_space<vmem>>, %arg3: memref<128x32xbf16, #tpu.memory_space<vmem>>, %arg4: memref<128x1xf32, #tpu.memory_space<vmem>>, %arg5: memref<3x128xbf16, #tpu.memory_space<vmem>>, %arg6: memref<3x1xf32, #tpu.memory_space<vmem>>, %arg7: memref<3x128xf32, #tpu.memory_space<vmem>>) attributes {dimension_semantics = [#tpu.dimension_semantics<parallel>], iteration_bounds = array<i64: 1>, scalar_prefetch = 0 : i64, scratch_operands = 0 : i64, tpu.core_type = #tpu.core_type<tc>, window_params = [{transform_indices = @transform_0, window_bounds = array<i64: 1, 128>}, {transform_indices = @transform_1, window_bounds = array<i64: 128, 32>}, {pipeline_mode = #tpu.pipeline_mode<synchronous>, transform_indices = @transform_2, window_bounds = array<i64: 128, 32>}, {pipeline_mode = #tpu.pipeline_mode<synchronous>, transform_indices = @transform_3, window_bounds = array<i64: 128, 1>}, {pipeline_mode = #tpu.pipeline_mode<synchronous>, transform_indices = @transform_4, window_bounds = array<i64: 3, 128>}, {pipeline_mode = #tpu.pipeline_mode<synchronous>, transform_indices = @transform_5, window_bounds = array<i64: 3, 1>}, {transform_indices = @transform_6, window_bounds = array<i64: 3, 128>}]} {
    %c0 = arith.constant 0 : index
    %c0_0 = arith.constant 0 : index
    %0 = vector.load %arg3[%c0, %c0_0] : memref<128x32xbf16, #tpu.memory_space<vmem>>, vector<128x32xbf16>
    %c0_1 = arith.constant 0 : index
    %c0_2 = arith.constant 0 : index
    %1 = vector.load %arg2[%c0_1, %c0_2] : memref<128x32xf32, #tpu.memory_space<vmem>>, vector<128x32xf32>
    %2 = arith.truncf %1 : vector<128x32xf32> to vector<128x32xbf16>
    %cst = arith.constant dense<0.000000e+00> : vector<128x128xf32>
    %3 = tpu.matmul %0, %2, %cst {dimension_numbers = #tpu.dot_dimension_numbers<[1], [1], [0], [0], [0, 0, 1, 0], [], []>} : vector<128x32xbf16>, vector<128x32xbf16>, vector<128x128xf32> -> vector<128x128xf32>
    %c0_3 = arith.constant 0 : index
    %c0_4 = arith.constant 0 : index
    %4 = vector.load %arg4[%c0_3, %c0_4] : memref<128x1xf32, #tpu.memory_space<vmem>>, vector<128x1xf32>
    %5 = vector.broadcast %4 : vector<128x1xf32> to vector<128x128xf32>
    %6 = arith.addf %3, %5 : vector<128x128xf32>
    %cst_5 = arith.constant 0.000000e+00 : f32
    %7 = vector.broadcast %cst_5 : f32 to vector<128x128xf32>
    %8 = arith.maximumf %6, %7 : vector<128x128xf32>
    %9 = arith.truncf %8 : vector<128x128xf32> to vector<128x128xbf16>
    %c0_6 = arith.constant 0 : index
    %c0_7 = arith.constant 0 : index
    %10 = vector.load %arg5[%c0_6, %c0_7] : memref<3x128xbf16, #tpu.memory_space<vmem>>, vector<3x128xbf16>
    %cst_8 = arith.constant dense<0.000000e+00> : vector<3x128xf32>
    %11 = tpu.matmul %10, %9, %cst_8 {dimension_numbers = #tpu.dot_dimension_numbers<[1], [0], [0], [1], [0, 0, 1, 1], [], []>} : vector<3x128xbf16>, vector<128x128xbf16>, vector<3x128xf32> -> vector<3x128xf32>
    %c0_9 = arith.constant 0 : index
    %c0_10 = arith.constant 0 : index
    %12 = vector.load %arg6[%c0_9, %c0_10] : memref<3x1xf32, #tpu.memory_space<vmem>>, vector<3x1xf32>
    %13 = vector.broadcast %12 : vector<3x1xf32> to vector<3x128xf32>
    %14 = arith.addf %11, %13 : vector<3x128xf32>
    %15 = tpu.iota {dimensions = array<i32: 0>} : vector<3x128xi32>
    %16 = arith.negf %14 : vector<3x128xf32>
    %17 = math.exp %16 : vector<3x128xf32>
    %cst_11 = arith.constant 1.000000e+00 : f32
    %18 = vector.broadcast %cst_11 : f32 to vector<3x128xf32>
    %19 = arith.addf %18, %17 : vector<3x128xf32>
    %20 = arith.divf %18, %19 : vector<3x128xf32>
    %c0_12 = arith.constant 0 : index
    %c0_13 = arith.constant 0 : index
    %21 = vector.load %arg1[%c0_12, %c0_13] : memref<1x128xf32, #tpu.memory_space<vmem>>, vector<1x128xf32>
    %22 = vector.broadcast %21 : vector<1x128xf32> to vector<3x128xf32>
    %23 = arith.mulf %20, %22 : vector<3x128xf32>
    %c0_i32 = arith.constant 0 : i32
    %24 = vector.broadcast %c0_i32 : i32 to vector<3x128xi32>
    %25 = arith.cmpi eq, %15, %24 : vector<3x128xi32>
    %26 = arith.select %25, %23, %14 : vector<3x128xi1>, vector<3x128xf32>
    %c0_14 = arith.constant 0 : index
    %c0_15 = arith.constant 0 : index
    %27 = vector.load %arg7[%c0_14, %c0_15] : memref<3x128xf32, #tpu.memory_space<vmem>>, vector<3x128xf32>
    tpu.vector_store %arg7[%c0_14, %c0_15], %26 {strides = array<i32>} : memref<3x128xf32, #tpu.memory_space<vmem>>, vector<3x128xf32>,
    return
  }
  func.func @transform_0(%arg0: i32) -> (i32, i32) {
    %c0_i32 = arith.constant 0 : i32
    %c0_i32_0 = arith.constant 0 : i32
    return %c0_i32, %arg0 : i32, i32
  }
  func.func @transform_1(%arg0: i32) -> (i32, i32) {
    %c0_i32 = arith.constant 0 : i32
    %c0_i32_0 = arith.constant 0 : i32
    return %arg0, %c0_i32 : i32, i32
  }
  func.func @transform_2(%arg0: i32) -> (i32, i32) {
    %c0_i32 = arith.constant 0 : i32
    %c0_i32_0 = arith.constant 0 : i32
    %c0_i32_1 = arith.constant 0 : i32
    return %c0_i32, %c0_i32_0 : i32, i32
  }
  func.func @transform_3(%arg0: i32) -> (i32, i32) {
    %c0_i32 = arith.constant 0 : i32
    %c0_i32_0 = arith.constant 0 : i32
    %c0_i32_1 = arith.constant 0 : i32
    return %c0_i32, %c0_i32_0 : i32, i32
  }
  func.func @transform_4(%arg0: i32) -> (i32, i32) {
    %c0_i32 = arith.constant 0 : i32
    %c0_i32_0 = arith.constant 0 : i32
    %c0_i32_1 = arith.constant 0 : i32
    return %c0_i32, %c0_i32_0 : i32, i32
  }
  func.func @transform_5(%arg0: i32) -> (i32, i32) {
    %c0_i32 = arith.constant 0 : i32
    %c0_i32_0 = arith.constant 0 : i32
    %c0_i32_1 = arith.constant 0 : i32
    return %c0_i32, %c0_i32_0 : i32, i32
  }
  func.func @transform_6(%arg0: i32) -> (i32, i32) {
    %c0_i32 = arith.constant 0 : i32
    %c0_i32_0 = arith.constant 0 : i32
    return %c0_i32, %arg0 : i32, i32
  }
}

</mosaic_0001>

<bundles_post_ra>
// kernel: squeeze.3
= control target key start
LH: loop header
LB: loop body
LE: loop exit
PB: predicated region body
PF: predicated region fallthrough
CT: control target
= control target key end

     0   :  { %vm7_vm0 = vcmask 64512   ;;  %s39_s0 = inlined_call_operand.vmem [shape: f32[16], index: 0, kind: input, shape index: {}]   ;;  %s40_s1 = inlined_call_operand.vmem [shape: f32[2,8], index: 1, kind: output, shape index: {}]  }
   0x1   :  { %v4_v0 = vld [vmem:[%s39_s0] sm:$0x1]  ;;  %s22_s0 = smov 120  }
   0x2   :  { %5 = vst [vmem:[#allocation1] sm:$0x1] %v4_v0 }
   0x9   :  { %v9_v1 = vld [vmem:[#allocation1] sm:$0x1]  }
   0xa   :  { %v6_v2 = vld [vmem:[#allocation1] sm:$0x1]   ;;  %10 = vrot.lane.b32.xlu0 %v9_v1, %s22_s0 }
   0xb   :  { %8 = vst.msk [vmem:[#allocation0] sm:$0x1] %vm7_vm0, %v6_v2  }
  0x7c   :  { %v11_v3 = vpop.permute.xlu0 %10  }
  0x7d   :  { %14 = vst.msk [vmem:[#allocation0 + $0x1] sm:$0x1] %vm7_vm0, %v11_v3  }
  0x84   :  { %v18_v4 = vld [vmem:[#allocation0] sm:$0x3] }
  0x85   :  { %20 = vst [vmem:[%s40_s1] sm:$0x3] %v18_v4 }

// kernel: boundary_head_forward.1
= control target key start
LH: loop header
LB: loop body
LE: loop exit
PB: predicated region body
PF: predicated region fallthrough
CT: control target
= control target key end

     0   :  { %vm200_vm0 = vcmask 261120   ;;  %v560_v3 = vmov 0   ;;  %v561_v58 = vmov 0.0   ;;  %vm562_vm1 = vmmov 0   ;;  %s763_s1 = inlined_call_operand.vmem [shape: f32[16,32], index: 1, kind: input, shape index: {}]   ;;  %s764_s2 = inlined_call_operand.vmem [shape: bf16[128,32], index: 2, kind: input, shape index: {}]   ;;  %s765_s3 = inlined_call_operand.vmem [shape: f32[128,1], index: 3, kind: input, shape index: {}]   ;;  %s766_s5 = inlined_call_operand.vmem [shape: f32[3,1], index: 5, kind: input, shape index: {}]   ;;  %s767_s4 = inlined_call_operand.vmem [shape: bf16[3,128], index: 4, kind: input, shape index: {}]   ;;  %s768_s0 = inlined_call_operand.vmem [shape: f32[1,16], index: 0, kind: input, shape index: {}]   ;;  %s769_s6 = inlined_call_operand.vmem [shape: f32[3,16], index: 6, kind: output, shape index: {}]  }
   0x1   :  { %v40_v0 = vld [vmem:[%s763_s1] sm:$0xff]  ;;  %v41_v1 = vld [vmem:[%s763_s1 + $0x8] sm:$0xff]  ;;  %v42_v2 = vld [vmem:[%s763_s1 + $0x10] sm:$0xff]  ;;  %546 = vset.pattern.permute.xlu0 %v560_v3  ;;  %547 = vset.pattern.permute.xlu1 %v560_v3 }
   0x2   :  { %v56_v4 = vpack.c.bf16 %v41_v1, %v40_v0  ;;  %v43_v5 = vld [vmem:[%s763_s1 + $0x18] sm:$0xff]  ;;  %v44_v8 = vld [vmem:[%s763_s1 + $0x20] sm:$0xff]  ;;  %v45_v9 = vld [vmem:[%s763_s1 + $0x28] sm:$0xff]  ;;  %515 = vmatprep.subr.bf16.mxu1 %v561_v58  ;;  %531 = vmatprep.mubr.msk.bf16.mxu1 %vm562_vm1, %v561_v58 }
   0x3   :  { %v57_v6 = vpack.c.bf16 %v43_v5, %v42_v2  ;;  %v548_v10 = vld [vmem:[%s764_s2] sm:$0xff]   ;;  %v58_v12 = vpack.c.bf16 %v45_v9, %v44_v8  ;;  %v46_v14 = vld [vmem:[%s763_s1 + $0x30] sm:$0xff]  ;;  %v47_v15 = vld [vmem:[%s763_s1 + $0x38] sm:$0xff] }
   0x4   :  { %535 = vmatprep.subr.msk.bf16.mxu0 %vm200_vm0, %v56_v4  ;;  %v226_v7 = vsel %vm200_vm0, %v56_v4, 0  ;;  %499 = vmatprep.mubr.msk.bf16.mxu0 %vm200_vm0, %v548_v10  ;;  %v64_v13 = vld [vmem:[%s765_s3] sm:$0xff]  ;;  %v66_v16 = vld [vmem:[%s765_s3 + $0x10] sm:$0xff]  ;;  %v65_v17 = vld [vmem:[%s765_s3 + $0x8] sm:$0xff]  ;;  %v59_v20 = vpack.c.bf16 %v47_v15, %v46_v14 }
   0x5   :  { %484 = vmatpush3.bf16.xpose.msra.mxu0 %v226_v7  ;;  %v229_v11 = vsel %vm200_vm0, %v57_v6, 0  ;;  %82 = vperm.xlu0 %546, %v64_v13   ;;  %v67_v18 = vld [vmem:[%s765_s3 + $0x18] sm:$0xff]  ;;  %v232_v19 = vsel %vm200_vm0, %v58_v12, 0  ;;  %v68_v21 = vld [vmem:[%s765_s3 + $0x20] sm:$0xff]  ;;  %v69_v22 = vld [vmem:[%s765_s3 + $0x28] sm:$0xff] }
   0x6   :  { %536 = vmatprep.subr.msk.bf16.mxu0 %vm200_vm0, %v57_v6  ;;  %92 = vperm.xlu1 %547, %v66_v16   ;;  %v48_v23 = vld [vmem:[%s763_s1 + $0x40] sm:$0xff]  ;;  %v49_v24 = vld [vmem:[%s763_s1 + $0x48] sm:$0xff]  ;;  %v70_v25 = vld [vmem:[%s765_s3 + $0x30] sm:$0xff]  ;;  %v235_v27 = vsel %vm200_vm0, %v59_v20, 0 }
   0x7   :  { %v71_v26 = vld [vmem:[%s765_s3 + $0x38] sm:$0xff]  ;;  %v60_v28 = vpack.c.bf16 %v49_v24, %v48_v23  ;;  %v72_v29 = vld [vmem:[%s765_s3 + $0x40] sm:$0xff]  ;;  %v73_v30 = vld [vmem:[%s765_s3 + $0x48] sm:$0xff] }
   0x8   :  { %v50_v31 = vld [vmem:[%s763_s1 + $0x50] sm:$0xff]  ;;  %v51_v32 = vld [vmem:[%s763_s1 + $0x58] sm:$0xff]  ;;  %v76_v37 = vld [vmem:[%s765_s3 + $0x60] sm:$0xff] }
   0x9   :  { %87 = vperm.xlu0 %546, %v65_v17   ;;  %v74_v33 = vld [vmem:[%s765_s3 + $0x50] sm:$0xff]  ;;  %v75_v34 = vld [vmem:[%s765_s3 + $0x58] sm:$0xff]  ;;  %v238_v35 = vsel %vm200_vm0, %v60_v28, 0  ;;  %v61_v36 = vpack.c.bf16 %v51_v32, %v50_v31  ;;  %v77_v38 = vld [vmem:[%s765_s3 + $0x68] sm:$0xff] }
   0xa   :  { %97 = vperm.xlu1 %547, %v67_v18   ;;  %v52_v39 = vld [vmem:[%s763_s1 + $0x60] sm:$0xff]  ;;  %v53_v40 = vld [vmem:[%s763_s1 + $0x68] sm:$0xff]  ;;  %v78_v41 = vld [vmem:[%s765_s3 + $0x70] sm:$0xff] }
   0xb   :  { %v79_v42 = vld [vmem:[%s765_s3 + $0x78] sm:$0xff]  ;;  %v241_v43 = vsel %vm200_vm0, %v61_v36, 0  ;;  %v62_v44 = vpack.c.bf16 %v53_v40, %v52_v39  ;;  %v371_v45 = vld [vmem:[%s766_s5] sm:$0x7]  ;;  %v54_v46 = vld [vmem:[%s763_s1 + $0x70] sm:$0xff] }
   0xc   :  { %v55_v47 = vld [vmem:[%s763_s1 + $0x78] sm:$0xff]  ;;  %v549_v51 = vld [vmem:[%s764_s2 + $0x8] sm:$0xff]   ;;  %v550_v52 = vld [vmem:[%s764_s2 + $0x10] sm:$0xff]  }
   0xd   :  { %486 = vmatpush3.bf16.xpose.msra.mxu0 %v229_v11  ;;  %102 = vperm.xlu0 %546, %v68_v21   ;;  %v244_v48 = vsel %vm200_vm0, %v62_v44, 0  ;;  %v63_v49 = vpack.c.bf16 %v55_v47, %v54_v46  ;;  %v551_v53 = vld [vmem:[%s764_s2 + $0x18] sm:$0xff]   ;;  %v552_v54 = vld [vmem:[%s764_s2 + $0x20] sm:$0xff]   ;;  %v553_v55 = vld [vmem:[%s764_s2 + $0x28] sm:$0xff]  }
   0xe   :  { %537 = vmatprep.subr.msk.bf16.mxu0 %vm200_vm0, %v58_v12  ;;  %107 = vperm.xlu1 %547, %v69_v22   ;;  %v554_v56 = vld [vmem:[%s764_s2 + $0x30] sm:$0xff]   ;;  %v555_v57 = vld [vmem:[%s764_s2 + $0x38] sm:$0xff]  }
   0xf   :  { %v247_v50 = vsel %vm200_vm0, %v63_v49, 0 }
  0x11   :  { %112 = vperm.xlu0 %546, %v70_v25  }
  0x12   :  { %117 = vperm.xlu1 %547, %v71_v26  }
  0x15   :  { %488 = vmatpush3.bf16.xpose.msra.mxu0 %v232_v19  ;;  %122 = vperm.xlu0 %546, %v72_v29  }
  0x16   :  { %538 = vmatprep.subr.msk.bf16.mxu0 %vm200_vm0, %v59_v20  ;;  %127 = vperm.xlu1 %547, %v73_v30  }
  0x19   :  { %132 = vperm.xlu0 %546, %v74_v33  }
  0x1a   :  { %137 = vperm.xlu1 %547, %v75_v34  }
  0x1d   :  { %490 = vmatpush3.bf16.xpose.msra.mxu0 %v235_v27  ;;  %142 = vperm.xlu0 %546, %v76_v37  }
  0x1e   :  { %539 = vmatprep.subr.msk.bf16.mxu0 %vm200_vm0, %v60_v28  ;;  %147 = vperm.xlu1 %547, %v77_v38  }
  0x21   :  { %152 = vperm.xlu0 %546, %v78_v41  }
  0x22   :  { %157 = vperm.xlu1 %547, %v79_v42  }
  0x25   :  { %492 = vmatpush3.bf16.xpose.msra.mxu0 %v238_v35  ;;  %374 = vperm.xlu0 %546, %v371_v45  }
  0x26   :  { %540 = vmatprep.subr.msk.bf16.mxu0 %vm200_vm0, %v61_v36 }
  0x2d   :  { %494 = vmatpush3.bf16.xpose.msra.mxu0 %v241_v43 }
  0x2e   :  { %541 = vmatprep.subr.msk.bf16.mxu0 %vm200_vm0, %v62_v44 }
  0x35   :  { %496 = vmatpush3.bf16.xpose.msra.mxu0 %v244_v48 }
  0x36   :  { %542 = vmatprep.subr.msk.bf16.mxu0 %vm200_vm0, %v63_v49 }
  0x3d   :  { %498 = vmatpush3.bf16.xpose.msra.mxu0 %v247_v50 }
  0x44   :  { %500 = vmatmul.mubr.msk.bf16.vlgmr.msra.gmra.mrb[0].mxu0 %vm200_vm0, %v549_v51 }
  0x45   :  { %503 = vmatprep.mubr.msk.bf16.mxu0 %vm200_vm0, %v550_v52 }
  0x4c   :  { %504 = vmatmul.mubr.msk.bf16.gmra.mrb[4].mxu0 %vm200_vm0, %v551_v53 }
  0x4d   :  { %507 = vmatprep.mubr.msk.bf16.mxu0 %vm200_vm0, %v552_v54 }
  0x54   :  { %508 = vmatmul.mubr.msk.bf16.gmra.mrb[8].mxu0 %vm200_vm0, %v553_v55 }
  0x55   :  { %511 = vmatprep.mubr.msk.bf16.mxu0 %vm200_vm0, %v554_v56 }
  0x5c   :  { %512 = vmatmul.mubr.msk.bf16.gmra.mrb[12].mxu0 %vm200_vm0, %v555_v57 }
  0x84   :  { %v83_v59 = vpop.permute.xlu0 %82 }
  0x85   :  { %v93_v60 = vpop.permute.xlu1 %92 }
  0x88   :  { %v88_v61 = vpop.permute.xlu0 %87 }
  0x89   :  { %v98_v62 = vpop.permute.xlu1 %97 }
  0x8c   :  { %v103_v63 = vpop.permute.xlu0 %102 }
  0x8d   :  { %v108_v0 = vpop.permute.xlu1 %107 }
  0x90   :  { %v113_v1 = vpop.permute.xlu0 %112 }
  0x91   :  { %v118_v5 = vpop.permute.xlu1 %117 }
  0x94   :  { %v123_v13 = vpop.permute.xlu0 %122 }
  0x95   :  { %v128_v17 = vpop.permute.xlu1 %127 }
  0x98   :  { %v133_v26 = vpop.permute.xlu0 %132 }
  0x99   :  { %v138_v30 = vpop.permute.xlu1 %137 }
  0x9c   :  { %v143_v38 = vpop.permute.xlu0 %142 }
  0x9d   :  { %v148_v43 = vpop.permute.xlu1 %147 }
  0xa0   :  { %v153_v50 = vpop.permute.xlu0 %152 }
  0xa1   :  { %v158_v55 = vpop.permute.xlu1 %157 }
 0x117   :  { %v501_v2 = vpop.f32.mrb[0].mxu0 }
 0x118   :  { %v292_v3 = vadd.f32 %v501_v2, %v93_v60  ;;  %v283_v4 = vpop.f32.mrb[1].mxu0 }
 0x119   :  { %v284_v6 = vadd.f32 %v283_v4, %v83_v59  ;;  %v502_v7 = vpop.f32.mrb[2].mxu0  ;;  %v370_v4 = vld [vmem:[%s767_s4] sm:$0x3] }
 0x11a   :  { %v295_v8 = vadd.f32 %v502_v7, %v98_v62  ;;  %v286_v9 = vpop.f32.mrb[3].mxu0  ;;  %v348_v11 = vmax.f32 %v292_v3, 0.0 }
 0x11b   :  { %v287_v10 = vadd.f32 %v286_v9, %v88_v61  ;;  %v346_v14 = vmax.f32 %v284_v6, 0.0 }
 0x11c   :  { %v349_v12 = vmax.f32 %v295_v8, 0.0 }
 0x11d   :  { %v347_v15 = vmax.f32 %v287_v10, 0.0 }
 0x11e   :  { %v363_v16 = vpack.c.bf16 %v349_v12, %v348_v11 }
 0x11f   :  { %v505_v18 = vpop.f32.mrb[4].mxu0  ;;  %v362_v19 = vpack.c.bf16 %v347_v15, %v346_v14  ;;  %v417_v14 = vlaneseq }
 0x120   :  { %v308_v20 = vadd.f32 %v505_v18, %v113_v1  ;;  %v299_v21 = vpop.f32.mrb[5].mxu0 }
 0x121   :  { %v300_v22 = vadd.f32 %v299_v21, %v103_v63  ;;  %v506_v23 = vpop.f32.mrb[6].mxu0  ;;  %516 = vmatpush3.bf16.msra.mxu1 %v362_v19  ;;  %v418_v15 = vshrl.u32 %v417_v14, 7 }
 0x122   :  { %v311_v24 = vadd.f32 %v506_v23, %v118_v5  ;;  %v302_v25 = vpop.f32.mrb[7].mxu0  ;;  %517 = vmatprep.subr.bf16.mxu1 %v561_v58  ;;  %v352_v28 = vmax.f32 %v308_v20, 0.0  ;;  %v375_v5 = vpop.permute.xlu0 %374 }
 0x123   :  { %v303_v27 = vadd.f32 %v302_v25, %v108_v0  ;;  %v350_v31 = vmax.f32 %v300_v22, 0.0  ;;  %vm433_vm2 = vcmp.eq.s32.totalorder %v418_v15, 0 }
 0x124   :  { %v353_v29 = vmax.f32 %v311_v24, 0.0 }
 0x125   :  { %v351_v32 = vmax.f32 %v303_v27, 0.0  ;;  %518 = vmatpush3.bf16.msra.mxu1 %v363_v16 }
 0x126   :  { %v365_v33 = vpack.c.bf16 %v353_v29, %v352_v28  ;;  %519 = vmatprep.subr.bf16.mxu1 %v561_v58 }
 0x127   :  { %v364_v34 = vpack.c.bf16 %v351_v32, %v350_v31  ;;  %v509_v35 = vpop.f32.mrb[8].mxu0 }
 0x128   :  { %v324_v36 = vadd.f32 %v509_v35, %v133_v26  ;;  %v315_v37 = vpop.f32.mrb[9].mxu0 }
 0x129   :  { %v316_v39 = vadd.f32 %v315_v37, %v123_v13  ;;  %v510_v40 = vpop.f32.mrb[10].mxu0  ;;  %520 = vmatpush3.bf16.msra.mxu1 %v364_v34 }
 0x12a   :  { %v327_v41 = vadd.f32 %v510_v40, %v138_v30  ;;  %v318_v42 = vpop.f32.mrb[11].mxu0  ;;  %521 = vmatprep.subr.bf16.mxu1 %v561_v58  ;;  %v356_v45 = vmax.f32 %v324_v36, 0.0 }
 0x12b   :  { %v319_v44 = vadd.f32 %v318_v42, %v128_v17  ;;  %v354_v47 = vmax.f32 %v316_v39, 0.0 }
 0x12c   :  { %v357_v46 = vmax.f32 %v327_v41, 0.0 }
 0x12d   :  { %v355_v48 = vmax.f32 %v319_v44, 0.0  ;;  %522 = vmatpush3.bf16.msra.mxu1 %v365_v33 }
 0x12e   :  { %v367_v49 = vpack.c.bf16 %v357_v46, %v356_v45  ;;  %523 = vmatprep.subr.bf16.mxu1 %v561_v58 }
 0x12f   :  { %v366_v51 = vpack.c.bf16 %v355_v48, %v354_v47  ;;  %v513_v52 = vpop.f32.mrb[12].mxu0 }
 0x130   :  { %v340_v53 = vadd.f32 %v513_v52, %v153_v50  ;;  %v331_v54 = vpop.f32.mrb[13].mxu0 }
 0x131   :  { %v332_v56 = vadd.f32 %v331_v54, %v143_v38  ;;  %v514_v57 = vpop.f32.mrb[14].mxu0  ;;  %524 = vmatpush3.bf16.msra.mxu1 %v366_v51 }
 0x132   :  { %v343_v59 = vadd.f32 %v514_v57, %v158_v55  ;;  %v334_v60 = vpop.f32.mrb[15].mxu0  ;;  %525 = vmatprep.subr.bf16.mxu1 %v561_v58  ;;  %v360_v62 = vmax.f32 %v340_v53, 0.0 }
 0x133   :  { %v335_v61 = vadd.f32 %v334_v60, %v148_v43  ;;  %v358_v0 = vmax.f32 %v332_v56, 0.0 }
 0x134   :  { %v361_v63 = vmax.f32 %v343_v59, 0.0 }
 0x135   :  { %v359_v1 = vmax.f32 %v335_v61, 0.0  ;;  %526 = vmatpush3.bf16.msra.mxu1 %v367_v49 }
 0x136   :  { %v369_v2 = vpack.c.bf16 %v361_v63, %v360_v62  ;;  %527 = vmatprep.subr.bf16.mxu1 %v561_v58 }
 0x137   :  { %v368_v3 = vpack.c.bf16 %v359_v1, %v358_v0 }
 0x139   :  { %528 = vmatpush3.bf16.msra.mxu1 %v368_v3 }
 0x13a   :  { %529 = vmatprep.subr.bf16.mxu1 %v561_v58  ;;  %v457_v58 = vld [vmem:[%s768_s0] ss:$0 sm:$0xff] }
 0x13d   :  { %530 = vmatpush3.bf16.msra.mxu1 %v369_v2 }
 0x140   :  { %532 = vmatmul.mubr.bf16.vlgmr.msra.gmra.mrb[0].mxu1 %v370_v4 }
 0x213   :  { %v411_v6 = vpop.f32.mrb[0].mxu1 }
 0x214   :  { %v412_v7 = vadd.f32 %v411_v6, %v375_v5  ;;  %v533_v8 = vpop.f32.mrb[1].mxu1 }
 0x215   :  { %v414_v9 = vpop.f32.mrb[2].mxu1 }
 0x216   :  { %v456_v10 = vmul.f32 -1.442695, %v412_v7  ;;  %v534_v11 = vpop.f32.mrb[3].mxu1 }
 0x218   :  { %556 = vpow2.f32 %v456_v10 }
 0x222   :  { %v557_v12 = vpop.eup %556 }
 0x223   :  { %v422_v13 = vadd.f32 1.0, %v557_v12 }
 0x225   :  { %558 = vrcp.f32 %v422_v13 }
 0x22f   :  { %v559_v16 = vpop.eup %558 }
 0x230   :  { %v432_v17 = vmul.f32 %v559_v16, %v457_v58 }
 0x232   :  { %v434_v18 = vsel %vm433_vm2, %v432_v17, %v412_v7 }
 0x233   :  { %435 = vst [vmem:[%s769_s6] sm:$0x7] %v434_v18 }

</bundles_post_ra>
